<compile_context>
chip_gen: v7x
topology: tpu7x:2x2x1
jax: 0.10.0
libtpu: 0.0.40
codegen_flags: <defaults>
</compile_context>

<pallas_src>
import math

import jax
import jax.numpy as jnp
from jax.experimental import pallas as pl
from jax.experimental.pallas import tpu as pltpu

_LANE = 128
_F32 = 4


# ---------------------------------------------------------------------------
# helpers mirrored from the PyTorch source (parameter-shape logic only)
# ---------------------------------------------------------------------------
def _py2_round(x):
    return math.floor(x + 0.5) if x >= 0.0 else math.ceil(x - 0.5)


def _get_divisible_by(num, divisible_by, min_val):
    ret = int(num)
    if divisible_by > 0 and num % divisible_by != 0:
        ret = int((_py2_round(num / divisible_by) or min_val) * divisible_by)
    return ret


def _fold_bn(gamma, beta, mean, var, eps=1e-5):
    scale = gamma / jnp.sqrt(var + eps)
    bias = beta - mean * scale
    return scale.reshape(1, -1), bias.reshape(1, -1)


# ---------------------------------------------------------------------------
# parameter prep: fold BN scales into weights, pad the mid dim to 128 lanes,
# optionally cast the MXU operands (1x1 conv weights) to bf16.
# ---------------------------------------------------------------------------
def prepare_params(raw_params, matmul_dtype=jnp.float32):
    (pw_w, pw_s, pw_b, dw_w, dw_s, dw_b, pwl_w, pwl_s, pwl_b) = raw_params
    mid = pw_w.shape[1]
    mid_p = ((mid + _LANE - 1) // _LANE) * _LANE

    def pad_to_midp(a, axis):
        pad = mid_p - a.shape[axis]
        if pad == 0:
            return a
        widths = [(0, 0)] * a.ndim
        widths[axis] = (0, pad)
        return jnp.pad(a, widths)

    pw_wf = pad_to_midp(pw_w * pw_s, 1).astype(matmul_dtype)    # [Cin, mid_p]
    pw_bf = pad_to_midp(pw_b, 1)                                 # [1, mid_p]
    dw_wf = pad_to_midp(dw_w * dw_s, 1)                          # [3, mid_p]  (VPU: f32)
    dw_bf = pad_to_midp(dw_b, 1)                                 # [1, mid_p]
    pwl_wf = pad_to_midp(pwl_w * pwl_s, 0).astype(matmul_dtype)  # [mid_p, Cout]
    pwl_bf = pwl_b                                               # [1, Cout]
    return (pw_wf, pw_bf, dw_wf, dw_bf, pwl_wf, pwl_bf)


# ---------------------------------------------------------------------------
# Pallas kernel: one batch-tile of the IRFBlock hot path per grid step.
# x_ref / o_ref: [TB, L, C] (channels-last); weights resident in VMEM.
# ---------------------------------------------------------------------------
def _irf_kernel(x_ref, pw_w_ref, pw_b_ref, dw_w_ref, dw_b_ref,
                pwl_w_ref, pwl_b_ref, o_ref):
    TB, L, Cin = x_ref.shape
    Cout = o_ref.shape[2]
    Mp = pw_w_ref.shape[1]

    x3 = x_ref[...]                                     # [TB, L, Cin] f32 (residual src)
    # Pure relabel when L % 8 == 0 (sublane grouping); still correct otherwise.
    x2 = x3.reshape(TB * L, Cin)

    # ---- pw: 1x1 conv == matmul over channels (BN scale pre-folded) + ReLU --
    y2 = jnp.dot(x2.astype(pw_w_ref.dtype), pw_w_ref[...],
                 preferred_element_type=jnp.float32)
    y2 = jnp.maximum(y2 + pw_b_ref[...], 0.0)           # [TB*L, Mp]

    # ---- dw: depthwise conv, k=3, stride=1, pad=1 (BN scale pre-folded) -----
    # Whole-tile 3-D formulation: one zero-halo concat along the sequence
    # axis, three static slices, no per-batch Python loop / concats.
    y3 = y2.reshape(TB, L, Mp)
    halo = jnp.zeros((TB, 1, Mp), dtype=y3.dtype)
    ypad = jnp.concatenate([halo, y3, halo], axis=1)    # [TB, L+2, Mp]
    w = dw_w_ref[...]                                   # [3, Mp]
    w0 = w[0:1, :].reshape(1, 1, Mp)
    w1 = w[1:2, :].reshape(1, 1, Mp)
    w2 = w[2:3, :].reshape(1, 1, Mp)
    d3 = (ypad[:, 0:L, :] * w0
          + ypad[:, 1:L + 1, :] * w1
          + ypad[:, 2:L + 2, :] * w2)
    d3 = jnp.maximum(d3 + dw_b_ref[...].reshape(1, 1, Mp), 0.0)  # [TB, L, Mp]

    # ---- pwl: 1x1 conv == matmul (BN scale pre-folded), no ReLU -------------
    d2 = d3.reshape(TB * L, Mp)
    out2 = jnp.dot(d2.astype(pwl_w_ref.dtype), pwl_w_ref[...],
                   preferred_element_type=jnp.float32)

    # ---- bias + residual connection (use_res_connect), f32 ------------------
    out2 = out2 + pwl_b_ref[...] + x2                   # [TB*L, Cout]
    o_ref[...] = out2.reshape(TB, L, Cout)


def _replicated_spec(a):
    zeros = (0,) * a.ndim
    # TODO(synk): pipeline_mode=pl.Buffered(1) (constant index_map -> a second
    # buffer copy is pure VMEM waste) once that kwarg is confirmed stable.
    return pl.BlockSpec(a.shape, lambda n, _z=zeros: _z)


def irf_block_forward_nlc(x_nlc, prepared, *, batch_tile=None):
    """Channels-last entry point. x_nlc: [N, L, Cin] f32 -> [N, L, Cout] f32."""
    (pw_w, pw_b, dw_w, dw_b, pwl_w, pwl_b) = prepared
    N, L, Cin = x_nlc.shape
    mid_p = pw_w.shape[1]
    Cout = pwl_w.shape[1]
    assert Cin == Cout, "default IRFBlock config uses the residual connection"

    params = (pw_w, pw_b, dw_w, dw_b, pwl_w, pwl_b)
    weight_bytes = sum(int(a.size) * a.dtype.itemsize for a in params)
    mm = jnp.dtype(pw_w.dtype).itemsize

    # Peak per-batch-row VMEM footprint (double-buffered IO tiles + the real
    # live intermediates: matmul-operand casts, halo-padded buffer, out2).
    per_b = (2 * L * Cin * _F32          # x tile, double-buffered
             + 2 * L * Cout * _F32       # out tile, double-buffered
             + L * Cin * mm              # pw matmul LHS cast
             + 5 * L * mid_p * _F32      # y2 / ypad / d3 + shift temporaries
             + L * mid_p * mm            # pwl matmul LHS cast
             + 2 * L * Cout * _F32)      # out2 + residual sum

    # Per-generation VMEM ceiling: ~48 MiB usable on v7x (64 MiB physical),
    # ~96 MiB on v5e/v6e (128 MiB).
    try:
        vmem_cap = int(pltpu.get_tpu_info().vmem_capacity_bytes)
    except Exception:
        vmem_cap = 64 * 1024 * 1024      # conservative fallback (v7x per-TC)
    vmem_ceiling = min(int(0.75 * vmem_cap), 100 * 1024 * 1024)

    if batch_tile is None:
        budget = max(vmem_ceiling - 2 * weight_bytes - (4 << 20), per_b)
        batch_tile = max(1, budget // per_b)
        if N >= 2:
            # keep >= 2 grid steps: DMA/compute overlap + v7x 2-TC megacore.
            batch_tile = min(batch_tile, -(-N // 2))
    batch_tile = int(min(max(int(batch_tile), 1), N))
    # Ragged tail blocks are masked by Pallas; per-row-independent math makes
    # the padded rows harmless (computed on garbage, discarded on store).
    grid = (pl.cdiv(N, batch_tile),)

    vmem_limit = int(min(max(batch_tile * per_b + 2 * weight_bytes + (4 << 20),
                             32 << 20),
                         vmem_ceiling))

    flops = int(N * L * (2 * Cin * mid_p + 2 * mid_p * Cout
                         + 8 * mid_p + 2 * Cout))
    bytes_accessed = int(_F32 * N * L * (Cin + Cout) + weight_bytes)

    return pl.pallas_call(
        _irf_kernel,
        out_shape=jax.ShapeDtypeStruct((N, L, Cout), jnp.float32),
        grid=grid,
        in_specs=[pl.BlockSpec((batch_tile, L, Cin), lambda n: (n, 0, 0))]
                 + [_replicated_spec(a) for a in params],
        out_specs=pl.BlockSpec((batch_tile, L, Cout), lambda n: (n, 0, 0)),
        compiler_params=pltpu.CompilerParams(
            dimension_semantics=("parallel",),
            vmem_limit_bytes=vmem_limit),
        cost_estimate=pl.CostEstimate(flops=flops, transcendentals=0,
                                      bytes_accessed=bytes_accessed),
    )(x_nlc, *params)


def irf_block_forward(x_ncl, prepared, **kw):
    """PyTorch-parity entry point (NCL). x_ncl: [N, Cin, L] -> [N, Cout, L].

    NOTE: the two transposes are full HBM read+write passes of the activation;
    channels-last models should call irf_block_forward_nlc directly.
    TODO(synk): fuse the NCL<->NLC layout change into the kernel (XLU slot is
    idle) to remove the extra activation HBM traffic for NCL callers.
    """
    x_nlc = jnp.transpose(x_ncl, (0, 2, 1))
    out_nlc = irf_block_forward_nlc(x_nlc, prepared, **kw)
    return jnp.transpose(out_nlc, (0, 2, 1))


# ---------------------------------------------------------------------------
# deterministic parameter construction (mirrors module __init__ shapes)
# ---------------------------------------------------------------------------
def make_params(key, input_depth, output_depth, expansion=2.0,
                kernel=3, width_divisor=1):
    mid = _get_divisible_by(int(input_depth * expansion),
                            width_divisor, width_divisor)
    ks = jax.random.split(key, 15)

    # pw: Conv1d(Cin, mid, 1), no bias -> weight stored transposed [Cin, mid]
    pw_w = jax.random.normal(ks[0], (input_depth, mid), jnp.float32)
    pw_w = pw_w * math.sqrt(2.0 / mid)                       # kaiming fan_out
    pw_s, pw_b = _fold_bn(
        0.5 + jax.random.uniform(ks[1], (mid,)),             # gamma
        0.1 * jax.random.normal(ks[2], (mid,)),              # beta
        0.1 * jax.random.normal(ks[3], (mid,)),              # running_mean
        0.5 + jax.random.uniform(ks[4], (mid,)))             # running_var

    # dw: Conv1d(mid, mid, k, groups=mid), no bias -> weight [k, mid]
    dw_w = jax.random.normal(ks[5], (kernel, mid), jnp.float32)
    dw_w = dw_w * math.sqrt(2.0 / kernel)
    dw_s, dw_b = _fold_bn(
        0.5 + jax.random.uniform(ks[6], (mid,)),
        0.1 * jax.random.normal(ks[7], (mid,)),
        0.1 * jax.random.normal(ks[8], (mid,)),
        0.5 + jax.random.uniform(ks[9], (mid,)))

    # pwl: Conv1d(mid, Cout, 1), no bias -> weight [mid, Cout]
    pwl_w = jax.random.normal(ks[10], (mid, output_depth), jnp.float32)
    pwl_w = pwl_w * math.sqrt(2.0 / output_depth)
    pwl_s, pwl_b = _fold_bn(
        0.5 + jax.random.uniform(ks[11], (output_depth,)),
        0.1 * jax.random.normal(ks[12], (output_depth,)),
        0.1 * jax.random.normal(ks[13], (output_depth,)),
        0.5 + jax.random.uniform(ks[14], (output_depth,)))

    return (pw_w, pw_s, pw_b, dw_w, dw_s, dw_b, pwl_w, pwl_s, pwl_b)


# ---------------------------------------------------------------------------
# pure-JAX reference on the raw (unfolded, unpadded) params
# ---------------------------------------------------------------------------
def irf_block_reference(x_ncl, raw_params):
    (pw_w, pw_s, pw_b, dw_w, dw_s, dw_b, pwl_w, pwl_s, pwl_b) = raw_params
    x = jnp.transpose(x_ncl, (0, 2, 1))                       # [N, L, Cin]
    L = x.shape[1]
    y = jnp.maximum(jnp.einsum('nlc,cm->nlm', x, pw_w) * pw_s + pw_b, 0.0)
    yp = jnp.pad(y, ((0, 0), (1, 1), (0, 0)))
    d = (yp[:, 0:L] * dw_w[0] + yp[:, 1:L + 1] * dw_w[1]
         + yp[:, 2:L + 2] * dw_w[2])
    d = jnp.maximum(d * dw_s + dw_b, 0.0)
    out = jnp.einsum('nlm,mo->nlo', d, pwl_w) * pwl_s + pwl_b
    out = out + x
    return jnp.transpose(out, (0, 2, 1))


if __name__ == "__main__":
    key = jax.random.PRNGKey(0)
    N, Cin, L = 4, 8, 16
    Cout = 8                      # == Cin -> residual path active (stride=1)

    kx, kx2, kp = jax.random.split(key, 3)
    x_ncl = jax.random.normal(kx, (N, Cin, L), dtype=jnp.float32)
    raw = make_params(kp, Cin, Cout, expansion=2.0, kernel=3)

    ref = irf_block_reference(x_ncl, raw)

    # f32 path, explicit batch_tile=2 -> 2-step pipelined grid
    prep_f32 = prepare_params(raw, matmul_dtype=jnp.float32)
    out_f32 = jax.block_until_ready(
        irf_block_forward(x_ncl, prep_f32, batch_tile=2))
    assert out_f32.shape == (N, Cout, L), out_f32.shape
    err_f32 = float(jnp.max(jnp.abs(out_f32 - ref)))
    assert err_f32 < 1e-4, f"f32 mismatch vs reference: {err_f32}"

    # auto-sized tiles + odd batch -> exercises cdiv grid with a ragged tail
    N2 = 5
    x2_ncl = jax.random.normal(kx2, (N2, Cin, L), dtype=jnp.float32)
    ref2 = irf_block_reference(x2_ncl, raw)
    out_auto = jax.block_until_ready(irf_block_forward(x2_ncl, prep_f32))
    assert out_auto.shape == (N2, Cout, L), out_auto.shape
    err_auto = float(jnp.max(jnp.abs(out_auto - ref2)))
    assert err_auto < 1e-4, f"ragged-tail mismatch vs reference: {err_auto}"

    # bf16 MXU-operand path (f32 accumulation, f32 elementwise + residual)
    prep_bf16 = prepare_params(raw, matmul_dtype=jnp.bfloat16)
    out_bf16 = jax.block_until_ready(
        irf_block_forward(x_ncl, prep_bf16, batch_tile=2))
    err_bf16 = float(jnp.max(jnp.abs(out_bf16 - ref)))
    assert err_bf16 < 1.5e-1, f"bf16 mismatch vs reference: {err_bf16}"

    print("KERNEL_OK")
</pallas_src>

<mosaic_0001>
module attributes {stable_mosaic.version = 11 : i64} {
  func.func @_irf_kernel(%arg0: i32, %arg1: memref<2x16x8xf32, #tpu.memory_space<vmem>>, %arg2: memref<8x128xf32, #tpu.memory_space<vmem>>, %arg3: memref<1x128xf32, #tpu.memory_space<vmem>>, %arg4: memref<3x128xf32, #tpu.memory_space<vmem>>, %arg5: memref<1x128xf32, #tpu.memory_space<vmem>>, %arg6: memref<128x8xf32, #tpu.memory_space<vmem>>, %arg7: memref<1x8xf32, #tpu.memory_space<vmem>>, %arg8: memref<2x16x8xf32, #tpu.memory_space<vmem>>) attributes {dimension_semantics = [#tpu.dimension_semantics<parallel>], iteration_bounds = array<i64: 2>, scalar_prefetch = 0 : i64, scratch_operands = 0 : i64, tpu.core_type = #tpu.core_type<tc>, window_params = [{transform_indices = @transform_0, window_bounds = array<i64: 2, 16, 8>}, {pipeline_mode = #tpu.pipeline_mode<synchronous>, transform_indices = @transform_1, window_bounds = array<i64: 8, 128>}, {pipeline_mode = #tpu.pipeline_mode<synchronous>, transform_indices = @transform_2, window_bounds = array<i64: 1, 128>}, {pipeline_mode = #tpu.pipeline_mode<synchronous>, transform_indices = @transform_3, window_bounds = array<i64: 3, 128>}, {pipeline_mode = #tpu.pipeline_mode<synchronous>, transform_indices = @transform_4, window_bounds = array<i64: 1, 128>}, {pipeline_mode = #tpu.pipeline_mode<synchronous>, transform_indices = @transform_5, window_bounds = array<i64: 128, 8>}, {pipeline_mode = #tpu.pipeline_mode<synchronous>, transform_indices = @transform_6, window_bounds = array<i64: 1, 8>}, {transform_indices = @transform_7, window_bounds = array<i64: 2, 16, 8>}]} {
    %c0 = arith.constant 0 : index
    %c0_0 = arith.constant 0 : index
    %c0_1 = arith.constant 0 : index
    %0 = vector.load %arg1[%c0, %c0_0, %c0_1] : memref<2x16x8xf32, #tpu.memory_space<vmem>>, vector<2x16x8xf32>
    %1 = vector.shape_cast %0 : vector<2x16x8xf32> to vector<32x8xf32>
    %c0_2 = arith.constant 0 : index
    %c0_3 = arith.constant 0 : index
    %2 = vector.load %arg2[%c0_2, %c0_3] : memref<8x128xf32, #tpu.memory_space<vmem>>, vector<8x128xf32>
    %cst = arith.constant dense<0.000000e+00> : vector<32x128xf32>
    %3 = tpu.matmul %1, %2, %cst {dimension_numbers = #tpu.dot_dimension_numbers<[1], [0], [0], [1], [0, 0, 1, 1], [], []>} : vector<32x8xf32>, vector<8x128xf32>, vector<32x128xf32> -> vector<32x128xf32>
    %c0_4 = arith.constant 0 : index
    %c0_5 = arith.constant 0 : index
    %4 = vector.load %arg3[%c0_4, %c0_5] : memref<1x128xf32, #tpu.memory_space<vmem>>, vector<1x128xf32>
    %5 = vector.broadcast %4 : vector<1x128xf32> to vector<32x128xf32>
    %6 = arith.addf %3, %5 : vector<32x128xf32>
    %cst_6 = arith.constant 0.000000e+00 : f32
    %7 = vector.broadcast %cst_6 : f32 to vector<32x128xf32>
    %8 = arith.maximumf %6, %7 : vector<32x128xf32>
    %9 = vector.shape_cast %8 : vector<32x128xf32> to vector<2x16x128xf32>
    %cst_7 = arith.constant 0.000000e+00 : f32
    %10 = vector.broadcast %cst_7 : f32 to vector<2x1x128xf32>
    %11 = tpu.concatenate %10, %9, %10 in 1 : vector<2x1x128xf32>, vector<2x16x128xf32>, vector<2x1x128xf32> -> vector<2x18x128xf32>
    %c0_8 = arith.constant 0 : index
    %c0_9 = arith.constant 0 : index
    %12 = vector.load %arg4[%c0_8, %c0_9] : memref<3x128xf32, #tpu.memory_space<vmem>>, vector<3x128xf32>
    %13 = vector.extract_strided_slice %12 {offsets = [0, 0], sizes = [1, 128], strides = [1, 1]} : vector<3x128xf32> to vector<1x128xf32>
    %14 = vector.shape_cast %13 : vector<1x128xf32> to vector<1x1x128xf32>
    %15 = vector.extract_strided_slice %12 {offsets = [1, 0], sizes = [1, 128], strides = [1, 1]} : vector<3x128xf32> to vector<1x128xf32>
    %16 = vector.shape_cast %15 : vector<1x128xf32> to vector<1x1x128xf32>
    %17 = vector.extract_strided_slice %12 {offsets = [2, 0], sizes = [1, 128], strides = [1, 1]} : vector<3x128xf32> to vector<1x128xf32>
    %18 = vector.shape_cast %17 : vector<1x128xf32> to vector<1x1x128xf32>
    %19 = vector.extract_strided_slice %11 {offsets = [0, 0, 0], sizes = [2, 16, 128], strides = [1, 1, 1]} : vector<2x18x128xf32> to vector<2x16x128xf32>
    %20 = vector.broadcast %14 : vector<1x1x128xf32> to vector<2x16x128xf32>
    %21 = arith.mulf %19, %20 : vector<2x16x128xf32>
    %22 = vector.extract_strided_slice %11 {offsets = [0, 1, 0], sizes = [2, 16, 128], strides = [1, 1, 1]} : vector<2x18x128xf32> to vector<2x16x128xf32>
    %23 = vector.broadcast %16 : vector<1x1x128xf32> to vector<2x16x128xf32>
    %24 = arith.mulf %22, %23 : vector<2x16x128xf32>
    %25 = arith.addf %21, %24 : vector<2x16x128xf32>
    %26 = vector.extract_strided_slice %11 {offsets = [0, 2, 0], sizes = [2, 16, 128], strides = [1, 1, 1]} : vector<2x18x128xf32> to vector<2x16x128xf32>
    %27 = vector.broadcast %18 : vector<1x1x128xf32> to vector<2x16x128xf32>
    %28 = arith.mulf %26, %27 : vector<2x16x128xf32>
    %29 = arith.addf %25, %28 : vector<2x16x128xf32>
    %c0_10 = arith.constant 0 : index
    %c0_11 = arith.constant 0 : index
    %30 = vector.load %arg5[%c0_10, %c0_11] : memref<1x128xf32, #tpu.memory_space<vmem>>, vector<1x128xf32>
    %31 = vector.shape_cast %30 : vector<1x128xf32> to vector<1x1x128xf32>
    %32 = vector.broadcast %31 : vector<1x1x128xf32> to vector<2x16x128xf32>
    %33 = arith.addf %29, %32 : vector<2x16x128xf32>
    %cst_12 = arith.constant 0.000000e+00 : f32
    %34 = vector.broadcast %cst_12 : f32 to vector<2x16x128xf32>
    %35 = arith.maximumf %33, %34 : vector<2x16x128xf32>
    %36 = vector.shape_cast %35 : vector<2x16x128xf32> to vector<32x128xf32>
    %c0_13 = arith.constant 0 : index
    %c0_14 = arith.constant 0 : index
    %37 = vector.load %arg6[%c0_13, %c0_14] : memref<128x8xf32, #tpu.memory_space<vmem>>, vector<128x8xf32>
    %cst_15 = arith.constant dense<0.000000e+00> : vector<32x8xf32>
    %38 = tpu.matmul %36, %37, %cst_15 {dimension_numbers = #tpu.dot_dimension_numbers<[1], [0], [0], [1], [0, 0, 1, 1], [], []>} : vector<32x128xf32>, vector<128x8xf32>, vector<32x8xf32> -> vector<32x8xf32>
    %c0_16 = arith.constant 0 : index
    %c0_17 = arith.constant 0 : index
    %39 = vector.load %arg7[%c0_16, %c0_17] : memref<1x8xf32, #tpu.memory_space<vmem>>, vector<1x8xf32>
    %40 = vector.broadcast %39 : vector<1x8xf32> to vector<32x8xf32>
    %41 = arith.addf %38, %40 : vector<32x8xf32>
    %42 = arith.addf %41, %1 : vector<32x8xf32>
    %43 = vector.shape_cast %42 : vector<32x8xf32> to vector<2x16x8xf32>
    %c0_18 = arith.constant 0 : index
    %c0_19 = arith.constant 0 : index
    %c0_20 = arith.constant 0 : index
    %44 = vector.load %arg8[%c0_18, %c0_19, %c0_20] : memref<2x16x8xf32, #tpu.memory_space<vmem>>, vector<2x16x8xf32>
    tpu.vector_store %arg8[%c0_18, %c0_19, %c0_20], %43 {strides = array<i32>} : memref<2x16x8xf32, #tpu.memory_space<vmem>>, vector<2x16x8xf32>,
    return
  }
  func.func @transform_0(%arg0: i32) -> (i32, i32, i32) {
    %c0_i32 = arith.constant 0 : i32
    %c0_i32_0 = arith.constant 0 : i32
    %c0_i32_1 = arith.constant 0 : i32
    return %arg0, %c0_i32, %c0_i32_0 : i32, i32, i32
  }
  func.func @transform_1(%arg0: i32) -> (i32, i32) {
    %c0_i32 = arith.constant 0 : i32
    %c0_i32_0 = arith.constant 0 : i32
    %c0_i32_1 = arith.constant 0 : i32
    return %c0_i32, %c0_i32_0 : i32, i32
  }
  func.func @transform_2(%arg0: i32) -> (i32, i32) {
    %c0_i32 = arith.constant 0 : i32
    %c0_i32_0 = arith.constant 0 : i32
    %c0_i32_1 = arith.constant 0 : i32
    return %c0_i32, %c0_i32_0 : i32, i32
  }
  func.func @transform_3(%arg0: i32) -> (i32, i32) {
    %c0_i32 = arith.constant 0 : i32
    %c0_i32_0 = arith.constant 0 : i32
    %c0_i32_1 = arith.constant 0 : i32
    return %c0_i32, %c0_i32_0 : i32, i32
  }
  func.func @transform_4(%arg0: i32) -> (i32, i32) {
    %c0_i32 = arith.constant 0 : i32
    %c0_i32_0 = arith.constant 0 : i32
    %c0_i32_1 = arith.constant 0 : i32
    return %c0_i32, %c0_i32_0 : i32, i32
  }
  func.func @transform_5(%arg0: i32) -> (i32, i32) {
    %c0_i32 = arith.constant 0 : i32
    %c0_i32_0 = arith.constant 0 : i32
    %c0_i32_1 = arith.constant 0 : i32
    return %c0_i32, %c0_i32_0 : i32, i32
  }
  func.func @transform_6(%arg0: i32) -> (i32, i32) {
    %c0_i32 = arith.constant 0 : i32
    %c0_i32_0 = arith.constant 0 : i32
    %c0_i32_1 = arith.constant 0 : i32
    return %c0_i32, %c0_i32_0 : i32, i32
  }
  func.func @transform_7(%arg0: i32) -> (i32, i32, i32) {
    %c0_i32 = arith.constant 0 : i32
    %c0_i32_0 = arith.constant 0 : i32
    %c0_i32_1 = arith.constant 0 : i32
    return %arg0, %c0_i32, %c0_i32_0 : i32, i32, i32
  }
}

</mosaic_0001>

<bundles_post_ra>
// kernel: tpu_custom_call.1
= control target key start
LH: loop header
LB: loop body
LE: loop exit
PB: predicated region body
PF: predicated region fallthrough
CT: control target
= control target key end

     0   :  { %s887_s24 = smov 0   ;;  %s1012_s0 = inlined_call_operand.vmem [shape: f32[4,16,8], index: 0, kind: input, shape index: {}]   ;;  %s1013_s1 = inlined_call_operand.vmem [shape: f32[8,128], index: 1, kind: input, shape index: {}]   ;;  %s1014_s2 = inlined_call_operand.vmem [shape: f32[1,128], index: 2, kind: input, shape index: {}]   ;;  %s1015_s3 = inlined_call_operand.vmem [shape: f32[3,128], index: 3, kind: input, shape index: {}]   ;;  %s1016_s4 = inlined_call_operand.vmem [shape: f32[1,128], index: 4, kind: input, shape index: {}]   ;;  %s1017_s5 = inlined_call_operand.vmem [shape: f32[128,8], index: 5, kind: input, shape index: {}]   ;;  %s1018_s6 = inlined_call_operand.vmem [shape: f32[1,8], index: 6, kind: input, shape index: {}]   ;;  %s1019_s7 = inlined_call_operand.vmem [shape: f32[4,16,8], index: 7, kind: output, shape index: {}]  }
   0x1 LB: > { %s690_s25 = sadd.s32 4294967295, %s845_s24   ;;  %p694_p0 = scmp.ge.s32.totalorder %s845_s24, 1  ;;  %s845_s24 = sphi %s887_s24, %s17_s24  }
   0x2   : > { %p239_p1 = scmp.lt.s32.totalorder %s845_s24, 3 }
   0x4   : > { %p240_p2 = pnand %p694_p0, %p239_p1 }
   0x5   : > { %v291_v0 = vld [vmem:[%s1013_s1] sm:$0xff] (!%p240_p2)  ;;  %s695_s28 = sshll.u32 (!%p240_p2), %s690_s25, 1  ;;  %v517_v2 = vld [vmem:[%s1017_s5 + $0x8] sm:$0xff] (!%p240_p2)  ;;  %v518_v4 = vld [vmem:[%s1017_s5 + $0x10] sm:$0xff] (!%p240_p2)  ;;  %vm299_vm0 = vcmask (!%p240_p2), 64512   ;;  %v423_v29 = vlaneseq (!%p240_p2)  ;;  %vm405_vm1 = vcmask (!%p240_p2), 1040384  }
   0x6   : > { %243 = sbr.rel (%p240_p2) target bundleno = 477 (0x1dd), region = 48  ;;  %v516_v1 = vld [vmem:[%s1017_s5] sm:$0xff] (!%p240_p2)  ;;  %737 = vmatprep.subr.mxu0 (!%p240_p2), %v291_v0  ;;  %p274_p3 = scmp.lt.s32.totalorder (!%p240_p2), %s695_s28, 3  ;;  %v519_v5 = vld [vmem:[%s1017_s5 + $0x18] sm:$0xff] (!%p240_p2)  ;;  %v521_v8 = vld [vmem:[%s1017_s5 + $0x28] sm:$0xff] (!%p240_p2)  ;;  %vm447_vm2 = vcmask (!%p240_p2), 1046528  }
   0x7   : > { %v783_v3 = vpack.c.bf16 (!%p240_p2), %v517_v2, %v516_v1  ;;  %738 = vmatpush3.msra.mxu0 (!%p240_p2), %v291_v0  ;;  %v787_v6 = vpack.c.bf16 (!%p240_p2), %v519_v5, %v518_v4  ;;  %v520_v7 = vld [vmem:[%s1017_s5 + $0x20] sm:$0xff] (!%p240_p2)  ;;  %v522_v14 = vld [vmem:[%s1017_s5 + $0x30] sm:$0xff] (!%p240_p2)  ;;  %v523_v15 = vld [vmem:[%s1017_s5 + $0x38] sm:$0xff] (!%p240_p2)  ;;  %v424_v30 = vshrl.u32 (!%p240_p2), %v423_v29, 7  ;;  %vm482_vm3 = vcmask (!%p240_p2), 1045504  }
   0x8   : > { %v791_v12 = vpack.c.bf16 (!%p240_p2), %v521_v8, %v520_v7  ;;  %v795_v16 = vpack.c.bf16 (!%p240_p2), %v523_v15, %v522_v14  ;;  %v524_v17 = vld [vmem:[%s1017_s5 + $0x40] sm:$0xff] (!%p240_p2)  ;;  %v525_v18 = vld [vmem:[%s1017_s5 + $0x48] sm:$0xff] (!%p240_p2)  ;;  %v526_v20 = vld [vmem:[%s1017_s5 + $0x50] sm:$0xff] (!%p240_p2) }
   0x9   : > { %784 = vmatprep.subr.bf16.mxu0 (!%p240_p2), %v783_v3  ;;  %815 = vmatprep.subr.bf16.mxu1 (!%p240_p2), %v783_v3  ;;  %v799_v19 = vpack.c.bf16 (!%p240_p2), %v525_v18, %v524_v17  ;;  %v527_v21 = vld [vmem:[%s1017_s5 + $0x58] sm:$0xff] (!%p240_p2)  ;;  %v528_v23 = vld [vmem:[%s1017_s5 + $0x60] sm:$0xff] (!%p240_p2)  ;;  %v529_v24 = vld [vmem:[%s1017_s5 + $0x68] sm:$0xff] (!%p240_p2)  ;;  %v433_v33 = vsub.s32 (!%p240_p2), 1, %v424_v30  ;;  %v468_v34 = vsub.s32 (!%p240_p2), 2, %v424_v30  ;;  %v425_v40 = vsub.s32 (!%p240_p2), 0, %v424_v30 }
   0xa   : > { %823 = vmatpush3.bf16.msra.mxu1 (!%p240_p2), %v783_v3  ;;  %v803_v22 = vpack.c.bf16 (!%p240_p2), %v527_v21, %v526_v20  ;;  %v807_v25 = vpack.c.bf16 (!%p240_p2), %v529_v24, %v528_v23  ;;  %v530_v26 = vld [vmem:[%s1017_s5 + $0x70] sm:$0xff] (!%p240_p2)  ;;  %v531_v27 = vld [vmem:[%s1017_s5 + $0x78] sm:$0xff] (!%p240_p2)  ;;  %v701_v31 = vld [vmem:[%s1014_s2] ss:$0 sm:$0xff] (!%p240_p2) }
   0xb   : > { %816 = vmatprep.subr.bf16.mxu1 (!%p240_p2), %v787_v6  ;;  %v811_v28 = vpack.c.bf16 (!%p240_p2), %v531_v27, %v530_v26  ;;  %v422_v36 = vld [vmem:[%s1015_s3] sm:$0x7] (!%p240_p2) }
   0xc   : > { %v434_v41 = vrot.slane (!%p240_p2), %v422_v36, %v433_v33  ;;  %v469_v42 = vrot.slane (!%p240_p2), %v422_v36, %v468_v34  ;;  %v426_v50 = vrot.slane (!%p240_p2), %v422_v36, %v425_v40  ;;  %v706_v29 = vld [vmem:[%s1016_s4] ss:$0 sm:$0xff] (!%p240_p2) }
   0xd   : > { %s1021_s28 = smov (!%p274_p3, %s695_s28), 3 }
   0xe   : > { %s710_s18 = sshll.u32 %s1021_s28, 4  ;;  %824 = vmatpush3.bf16.msra.mxu1 %v787_v6 }
   0xf   : > { %s278_s21 = scalar_lea.vmem %s1012_s0, %s710_s18  ;;  %817 = vmatprep.subr.bf16.mxu1 %v791_v12  ;;  %s285_s11 = scalar_lea.vmem %s1019_s7, %s710_s18 }
  0x10   : > { %v924_v9 = vld [vmem:[%s278_s21] sm:$0xff]  ;;  %v926_v10 = vld [vmem:[%s278_s21 + $0x8] sm:$0xff]  ;;  %v928_v11 = vld [vmem:[%s278_s21 + $0x10] sm:$0xff] }
  0x11   : > { %739 = vmatprep.mubr.msk.f32.mxu0 %vm299_vm0, %v924_v9  ;;  %v936_v13 = vld [vmem:[%s278_s21 + $0x18] sm:$0xff] }
  0x12   : > { %740 = vmatmul.mubr.msk.f32.vlgmr.msra.gmra.mrb[0].mxu0 %vm299_vm0, %v926_v10  ;;  %825 = vmatpush3.bf16.msra.mxu1 %v791_v12 }
  0x13   : > { %742 = vmatprep.mubr.msk.f32.mxu0 %vm299_vm0, %v928_v11  ;;  %786 = vmatpush3.bf16.msra.mxu0 %v783_v3 }
  0x14   : > { %788 = vmatprep.subr.bf16.mxu0 %v787_v6  ;;  %818 = vmatprep.subr.bf16.mxu1 %v795_v16 }
  0x16   : > { %743 = vmatmul.mubr.msk.f32.gmra.mrb[2].mxu0 %vm299_vm0, %v936_v13  ;;  %826 = vmatpush3.bf16.msra.mxu1 %v795_v16 }
  0x17   : > { %790 = vmatpush3.bf16.msra.mxu0 %v787_v6  ;;  %819 = vmatprep.subr.bf16.mxu1 %v799_v19 }
  0x18   : > { %792 = vmatprep.subr.bf16.mxu0 %v791_v12 }
  0x1a   : > { %827 = vmatpush3.bf16.msra.mxu1 %v799_v19 }
  0x1b   : > { %794 = vmatpush3.bf16.msra.mxu0 %v791_v12  ;;  %820 = vmatprep.subr.bf16.mxu1 %v803_v22 }
  0x1c   : > { %796 = vmatprep.subr.bf16.mxu0 %v795_v16 }
  0x1e   : > { %828 = vmatpush3.bf16.msra.mxu1 %v803_v22 }
  0x1f   : > { %798 = vmatpush3.bf16.msra.mxu0 %v795_v16  ;;  %821 = vmatprep.subr.bf16.mxu1 %v807_v25 }
  0x20   : > { %800 = vmatprep.subr.bf16.mxu0 %v799_v19 }
  0x22   : > { %829 = vmatpush3.bf16.msra.mxu1 %v807_v25 }
  0x23   : > { %802 = vmatpush3.bf16.msra.mxu0 %v799_v19  ;;  %822 = vmatprep.subr.bf16.mxu1 %v811_v28 }
  0x24   : > { %804 = vmatprep.subr.bf16.mxu0 %v803_v22 }
  0x26   : > { %830 = vmatpush3.bf16.msra.mxu1 %v811_v28 }
  0x27   : > { %806 = vmatpush3.bf16.msra.mxu0 %v803_v22 }
  0x28   : > { %808 = vmatprep.subr.bf16.mxu0 %v807_v25 }
  0x2b   : > { %810 = vmatpush3.bf16.msra.mxu0 %v807_v25 }
  0x2c   : > { %812 = vmatprep.subr.bf16.mxu0 %v811_v28 }
  0x2f   : > { %814 = vmatpush3.bf16.msra.mxu0 %v811_v28 }
  0xe5   : > { %v741_v32 = vpop.f32.mrb[0].mxu0 }
  0xe6   : > { %v384_v35 = vadd.f32 %v741_v32, %v701_v31  ;;  %v378_v37 = vpop.f32.mrb[1].mxu0 }
  0xe7   : > { %v379_v38 = vadd.f32 %v701_v31, %v378_v37 }
  0xe8   : > { %v398_v39 = vmax.f32 %v384_v35, 0.0 }
  0xe9   : > { %v397_v43 = vmax.f32 %v379_v38, 0.0  ;;  %v744_v44 = vpop.f32.mrb[2].mxu0 }
  0xea   : > { %v407_v45 = vrot.slane %v398_v39, 7  ;;  %v394_v46 = vadd.f32 %v744_v44, %v701_v31  ;;  %v388_v47 = vpop.f32.mrb[3].mxu0 }
  0xeb   : > { %v406_v48 = vrot.slane %v397_v43, 7  ;;  %v389_v52 = vadd.f32 %v701_v31, %v388_v47 }
  0xec   : > { %v420_v49 = vsel %vm405_vm1, %v407_v45, 0.0  ;;  %v400_v51 = vmax.f32 %v394_v46, 0.0 }
  0xed   : > { %v437_v53 = vmul.f32 %v434_v41, %v420_v49  ;;  %v472_v54 = vmul.f32 %v469_v42, %v420_v49  ;;  %v408_v55 = vsel %vm405_vm1, %v406_v48, %v407_v45  ;;  %v418_v56 = vsel %vm405_vm1, 0.0, %v406_v48 }
  0xee   : > { %v435_v57 = vmul.f32 %v434_v41, %v418_v56  ;;  %v436_v58 = vmul.f32 %v434_v41, %v408_v55  ;;  %v470_v61 = vmul.f32 %v469_v42, %v418_v56  ;;  %v471_v62 = vmul.f32 %v469_v42, %v408_v55 }
  0xef   : > { %v451_v59 = vrot.slane %v437_v53, 1  ;;  %v486_v60 = vrot.slane %v472_v54, 2  ;;  %v410_v1 = vrot.slane %v400_v51, 7  ;;  %v399_v2 = vmax.f32 %v389_v52, 0.0  ;;  %v707_v54 = vld [vmem:[%s1018_s6] ss:$0 sm:$0xff] }
  0xf0   : > { %v448_v63 = vrot.slane %v435_v57, 1  ;;  %v449_v0 = vrot.slane %v436_v58, 1  ;;  %v427_v3 = vmul.f32 %v426_v50, %v418_v56  ;;  %v428_v4 = vmul.f32 %v426_v50, %v408_v55 }
  0xf1   : > { %v483_v5 = vrot.slane %v470_v61, 2  ;;  %v484_v6 = vrot.slane %v471_v62, 2  ;;  %v421_v12 = vsel %vm405_vm1, %v410_v1, 0.0  ;;  %v409_v14 = vrot.slane %v399_v2, 7 }
  0xf2   : > { %v450_v7 = vsel %vm447_vm2, %v448_v63, %v449_v0  ;;  %v452_v8 = vsel %vm447_vm2, %v449_v0, %v451_v59  ;;  %v440_v17 = vmul.f32 %v434_v41, %v421_v12  ;;  %v475_v18 = vmul.f32 %v469_v42, %v421_v12 }
  0xf3   : > { %v462_v15 = vadd.f32 %v450_v7, %v427_v3  ;;  %v463_v16 = vadd.f32 %v452_v8, %v428_v4  ;;  %v411_v19 = vsel %vm405_vm1, %v409_v14, %v410_v1  ;;  %v419_v20 = vsel %vm405_vm1, 0.0, %v409_v14 }
  0xf4   : > { %v485_v21 = vsel %vm482_vm3, %v483_v5, %v484_v6  ;;  %v487_v22 = vsel %vm482_vm3, %v484_v6, %v486_v60  ;;  %v456_v23 = vrot.slane %v440_v17, 1  ;;  %v491_v24 = vrot.slane %v475_v18, 2 }
  0xf5   : > { %v438_v25 = vmul.f32 %v434_v41, %v419_v20  ;;  %v439_v26 = vmul.f32 %v434_v41, %v411_v19  ;;  %v473_v27 = vmul.f32 %v469_v42, %v419_v20  ;;  %v474_v28 = vmul.f32 %v469_v42, %v411_v19 }
  0xf6   : > { %v497_v30 = vadd.f32 %v485_v21, %v462_v15  ;;  %v498_v31 = vadd.f32 %v487_v22, %v463_v16  ;;  %v429_v36 = vmul.f32 %v426_v50, %v419_v20  ;;  %v430_v37 = vmul.f32 %v426_v50, %v411_v19 }
  0xf7   : > { %v453_v32 = vrot.slane %v438_v25, 1  ;;  %v454_v33 = vrot.slane %v439_v26, 1  ;;  %v488_v34 = vrot.slane %v473_v27, 2  ;;  %v489_v35 = vrot.slane %v474_v28, 2 }
  0xf8   : > { %v508_v38 = vadd.f32 %v706_v29, %v497_v30  ;;  %v509_v39 = vadd.f32 %v706_v29, %v498_v31 }
  0xf9   : > { %v455_v40 = vsel %vm447_vm2, %v453_v32, %v454_v33  ;;  %v490_v41 = vsel %vm482_vm3, %v488_v34, %v489_v35  ;;  %v457_v42 = vsel %vm447_vm2, %v454_v33, %v456_v23  ;;  %v492_v43 = vsel %vm482_vm3, %v489_v35, %v491_v24 }
  0xfa   : > { %v512_v44 = vmax.f32 %v508_v38, 0.0  ;;  %v513_v45 = vmax.f32 %v509_v39, 0.0  ;;  %v464_v46 = vadd.f32 %v455_v40, %v429_v36  ;;  %v465_v47 = vadd.f32 %v457_v42, %v430_v37 }
  0xfc   : > { %777 = vmatprep.mubr.f32.mxu0 %v512_v44  ;;  %v499_v48 = vadd.f32 %v490_v41, %v464_v46  ;;  %v500_v49 = vadd.f32 %v492_v43, %v465_v47 }
  0xfd   : > { %778 = vmatmul.mubr.f32.vlgmr.msra.gmra.mrb[4].mxu0 %v513_v45 }
  0xfe   : > { %v510_v50 = vadd.f32 %v706_v29, %v499_v48  ;;  %v511_v51 = vadd.f32 %v706_v29, %v500_v49 }
 0x100   : > { %v514_v52 = vmax.f32 %v510_v50, 0.0  ;;  %v515_v53 = vmax.f32 %v511_v51, 0.0 }
 0x102   : > { %780 = vmatprep.mubr.f32.mxu1 %v514_v52 }
 0x103   : > { %781 = vmatmul.mubr.f32.vlgmr.msra.gmra.mrb[0].mxu1 %v515_v53 }
 0x1d0   : > { %v779_v55 = vpop.f32.mrb[4].mxu0 }
 0x1d1   : > { %v611_v56 = vadd.f32 %v779_v55, %v707_v54  ;;  %v605_v57 = vpop.f32.mrb[5].mxu0 }
 0x1d2   : > { %v606_v58 = vadd.f32 %v707_v54, %v605_v57 }
 0x1d3   : > { %v625_v59 = vadd.f32 %v611_v56, %v926_v10 }
 0x1d4   : > { %v624_v60 = vadd.f32 %v606_v58, %v924_v9 }
 0x1d5   : > { %629 = vst.msk [vmem:[%s285_s11 + $0x8] sm:$0xff] %vm299_vm0, %v625_v59 }
 0x1d6   : > { %628 = vst.msk [vmem:[%s285_s11] sm:$0xff] %vm299_vm0, %v624_v60  ;;  %v782_v61 = vpop.f32.mrb[0].mxu1 }
 0x1d7   : > { %v621_v62 = vadd.f32 %v782_v61, %v707_v54  ;;  %v615_v63 = vpop.f32.mrb[1].mxu1 }
 0x1d8   : > { %v616_v0 = vadd.f32 %v707_v54, %v615_v63 }
 0x1d9   : > { %v627_v1 = vadd.f32 %v621_v62, %v936_v13 }
 0x1da   : > { %v626_v2 = vadd.f32 %v616_v0, %v928_v11 }
 0x1db   : > { %631 = vst.msk [vmem:[%s285_s11 + $0x18] sm:$0xff] %vm299_vm0, %v627_v1 }
 0x1dc   : > { %630 = vst.msk [vmem:[%s285_s11 + $0x10] sm:$0xff] %vm299_vm0, %v626_v2 }
 0x1dd PF: > { %s17_s24 = sadd.s32 1, %s845_s24  }
 0x1de   : > { %p14_p4 = scmp.ge.s32.totalorder %s17_s24, 4  }
 0x1e0   :  { %16 = sbr.rel (!%p14_p4) target bundleno = 1 (0x1), region = 78 }

</bundles_post_ra>
